<compile_context>
chip_gen: v7x
topology: tpu7x:2x2x1
jax: 0.10.0
libtpu: 0.0.40
codegen_flags: <defaults>
</compile_context>

<pallas_src>
import functools

import jax
import jax.numpy as jnp
from jax.experimental import pallas as pl
from jax.experimental.pallas import tpu as pltpu


# --------------------------------------------------------------------------- #
# Kernel
# --------------------------------------------------------------------------- #
def _make_kernel(matmul_dtype):
    def _mlp_kernel(x_ref, w1_ref, b1_ref, w2_ref, b2_ref, o_ref):
        # Layer 1: Linear + ReLU.  Operands cast to matmul_dtype (bf16 by
        # default), accumulation in f32 on the MXU; bias add / ReLU in f32.
        x = x_ref[...].astype(matmul_dtype)
        w1 = w1_ref[...].astype(matmul_dtype)
        h = jnp.dot(x, w1, preferred_element_type=jnp.float32) + b1_ref[...]
        h = jnp.maximum(h, 0.0)
        # Layer 2: Linear.
        w2 = w2_ref[...].astype(matmul_dtype)
        out = jnp.dot(h.astype(matmul_dtype), w2,
                      preferred_element_type=jnp.float32) + b2_ref[...]
        # Full-width (multiple-of-128-lane) dense store.
        o_ref[...] = out.astype(o_ref.dtype)

    return _mlp_kernel


# --------------------------------------------------------------------------- #
# Helpers
# --------------------------------------------------------------------------- #
def _round_up(x, m):
    return ((x + m - 1) // m) * m


def _pack_factor(d_in, d_out):
    """Frames packed per 128-lane-aligned row.

    Chosen so BOTH P*d_in and P*d_out are multiples of 128 (lane-dense loads
    and stores).  Falls back to 1 (still correct) for awkward dims.
    """
    if (0 < d_in <= 128 and 0 < d_out <= 128
            and 128 % d_in == 0 and 128 % d_out == 0):
        return max(128 // d_in, 128 // d_out)
    return 1


def _block_diag(w, n):
    """Block-diagonal with n copies of w: (a, b) -> (n*a, n*b)."""
    if n == 1:
        return w
    a, b = w.shape
    eye = jnp.eye(n, dtype=w.dtype)
    return (eye[:, None, :, None] * w[None, :, None, :]).reshape(n * a, n * b)


def _run_packed(x_packed, w1p, b1p, w2p, b2p, *, tb, matmul_dtype):
    """One pallas_call over an already-packed, tile-divisible (rows, P*d_in)."""
    rows, in_w = x_packed.shape
    hid_w = w1p.shape[1]
    out_w = w2p.shape[1]
    assert rows % tb == 0 and tb % 8 == 0
    grid = (rows // tb,)

    cost = pl.CostEstimate(
        flops=2 * rows * (in_w * hid_w + hid_w * out_w),   # packed (inflated)
        transcendentals=0,
        bytes_accessed=4 * (rows * (in_w + out_w)
                            + w1p.size + b1p.size + w2p.size + b2p.size),
    )

    return pl.pallas_call(
        _make_kernel(matmul_dtype),
        out_shape=jax.ShapeDtypeStruct((rows, out_w), jnp.float32),
        grid=grid,
        in_specs=[
            # x: tiled along packed-batch axis, double-buffered, 128n lanes.
            pl.BlockSpec((tb, in_w), lambda i: (i, 0)),
            # Weights / biases: full extent, VMEM-resident for all steps.
            pl.BlockSpec((in_w, hid_w), lambda i: (0, 0)),
            pl.BlockSpec((1, hid_w), lambda i: (0, 0)),
            pl.BlockSpec((hid_w, out_w), lambda i: (0, 0)),
            pl.BlockSpec((1, out_w), lambda i: (0, 0)),
        ],
        out_specs=pl.BlockSpec((tb, out_w), lambda i: (i, 0)),
        compiler_params=pltpu.CompilerParams(
            # Batch axis is embarrassingly parallel (megacore-shardable on
            # v7x; no-op on single-TC v5e/v6e).
            dimension_semantics=("parallel",),
            # ~<=30 MiB/step at tb=4096 with the widths used here; 48 MiB
            # leaves headroom and still fits v7x's 64 MiB physical VMEM.
            vmem_limit_bytes=48 * 1024 * 1024,
        ),
        cost_estimate=cost,
    )(x_packed, w1p, b1p, w2p, b2p)


# --------------------------------------------------------------------------- #
# Forward pass (semantics of FrameClassifier.forward)
# --------------------------------------------------------------------------- #
@functools.partial(jax.jit, static_argnames=("block_rows", "matmul_dtype"))
def frame_classifier_forward(x, w1, b1, w2, b2, *, block_rows=4096,
                             matmul_dtype=jnp.bfloat16):
    """x: (B, d_in) f32; w1: (d_in, hidden); b1: (1, hidden);
    w2: (hidden, d_out); b2: (1, d_out).  Returns (B, d_out) f32.

    Weights are stored transposed vs. PyTorch: (in_features, out_features).
    """
    B, d_in = x.shape
    hidden = w1.shape[1]
    d_out = w2.shape[1]
    assert w1.shape == (d_in, hidden)
    assert w2.shape == (hidden, d_out)

    P = _pack_factor(d_in, d_out)          # frames per packed row (16 here)

    # Packed (block-diagonal) weights / tiled biases.  Exact math (zeros
    # contribute exactly 0).  Tiny; traced once per shape under jit — for a
    # production loop, hoist this packing out and reuse.
    w1p = _block_diag(w1, P)                               # (P*d_in,  P*hidden)
    w2p = _block_diag(w2, P)                               # (P*hidden, P*d_out)
    b1p = jnp.tile(b1.reshape(1, hidden), (1, P))          # (1, P*hidden)
    b2p = jnp.tile(b2.reshape(1, d_out), (1, P))           # (1, P*d_out)

    # Rows per batch tile: multiple of 8 sublanes, capped by total rows.
    rows_total = -(-B // P)
    tb = max(8, min(_round_up(block_rows, 8), _round_up(rows_total, 8)))
    frames_per_tile = tb * P

    outs = []

    # --- Bulk: whole tiles, zero-copy (reshape of a contiguous prefix). -----
    n_full = B // frames_per_tile
    b_bulk = n_full * frames_per_tile
    if n_full > 0:
        x_bulk = x[:b_bulk].reshape(n_full * tb, P * d_in)   # bitcast if b_bulk==B
        out_bulk = _run_packed(x_bulk, w1p, b1p, w2p, b2p,
                               tb=tb, matmul_dtype=matmul_dtype)
        outs.append(out_bulk.reshape(b_bulk, d_out))          # free reshape

    # --- Tail: < one tile of frames, pad only this small remainder. ---------
    b_tail = B - b_bulk
    if b_tail > 0:
        rows_tail = _round_up(-(-b_tail // P), 8)
        pad_frames = rows_tail * P - b_tail
        x_tail = jnp.pad(x[b_bulk:], ((0, pad_frames), (0, 0)))
        x_tail = x_tail.reshape(rows_tail, P * d_in)
        out_tail = _run_packed(x_tail, w1p, b1p, w2p, b2p,
                               tb=rows_tail, matmul_dtype=matmul_dtype)
        outs.append(out_tail.reshape(rows_tail * P, d_out)[:b_tail])

    return outs[0] if len(outs) == 1 else jnp.concatenate(outs, axis=0)


# --------------------------------------------------------------------------- #
# Parameter init (mirrors nn.Linear default init, stored transposed)
# --------------------------------------------------------------------------- #
def init_params(key, input_dim, hidden, output_dim):
    k1, k2, k3, k4 = jax.random.split(key, 4)
    bound1 = 1.0 / jnp.sqrt(input_dim)
    bound2 = 1.0 / jnp.sqrt(hidden)
    w1 = jax.random.uniform(k1, (input_dim, hidden), jnp.float32, -bound1, bound1)
    b1 = jax.random.uniform(k2, (1, hidden), jnp.float32, -bound1, bound1)
    w2 = jax.random.uniform(k3, (hidden, output_dim), jnp.float32, -bound2, bound2)
    b2 = jax.random.uniform(k4, (1, output_dim), jnp.float32, -bound2, bound2)
    return w1, b1, w2, b2


if __name__ == "__main__":
    key = jax.random.PRNGKey(0)
    # Small shapes consistent with the module (hidden fixed at 32 by the spec);
    # batch deliberately not a multiple of the pack factor to exercise padding.
    batch, input_dim, hidden, output_dim = 200, 16, 32, 8

    k_x, k_p = jax.random.split(key)
    x = jax.random.normal(k_x, (batch, input_dim), jnp.float32)
    w1, b1, w2, b2 = init_params(k_p, input_dim, hidden, output_dim)

    # Plain-JAX reference (same math as the PyTorch module).
    ref = jnp.maximum(x @ w1 + b1, 0.0) @ w2 + b2

    # 1) Exact-f32 path: tight correctness check.
    out_f32 = frame_classifier_forward(x, w1, b1, w2, b2,
                                       matmul_dtype=jnp.float32)
    out_f32 = jax.block_until_ready(out_f32)
    assert out_f32.shape == (batch, output_dim)
    assert jnp.allclose(out_f32, ref, atol=2e-5, rtol=1e-5)

    # 2) Default bf16-operand / f32-accumulate path (perf default, esp. v5e):
    #    looser tolerance against the f32 reference.
    out_bf16 = jax.block_until_ready(frame_classifier_forward(x, w1, b1, w2, b2))
    assert out_bf16.shape == (batch, output_dim)
    assert jnp.allclose(out_bf16, ref, atol=5e-2, rtol=5e-2)

    print("KERNEL_OK")
</pallas_src>

<mosaic_0001>
module attributes {stable_mosaic.version = 11 : i64} {
  func.func @_mlp_kernel(%arg0: i32, %arg1: memref<16x256xf32, #tpu.memory_space<vmem>>, %arg2: memref<256x512xf32, #tpu.memory_space<vmem>>, %arg3: memref<1x512xf32, #tpu.memory_space<vmem>>, %arg4: memref<512x128xf32, #tpu.memory_space<vmem>>, %arg5: memref<1x128xf32, #tpu.memory_space<vmem>>, %arg6: memref<16x128xf32, #tpu.memory_space<vmem>>) attributes {dimension_semantics = [#tpu.dimension_semantics<parallel>], iteration_bounds = array<i64: 1>, scalar_prefetch = 0 : i64, scratch_operands = 0 : i64, tpu.core_type = #tpu.core_type<tc>, window_params = [{transform_indices = @transform_0, window_bounds = array<i64: 16, 256>}, {pipeline_mode = #tpu.pipeline_mode<synchronous>, transform_indices = @transform_1, window_bounds = array<i64: 256, 512>}, {pipeline_mode = #tpu.pipeline_mode<synchronous>, transform_indices = @transform_2, window_bounds = array<i64: 1, 512>}, {pipeline_mode = #tpu.pipeline_mode<synchronous>, transform_indices = @transform_3, window_bounds = array<i64: 512, 128>}, {pipeline_mode = #tpu.pipeline_mode<synchronous>, transform_indices = @transform_4, window_bounds = array<i64: 1, 128>}, {transform_indices = @transform_5, window_bounds = array<i64: 16, 128>}]} {
    %c0 = arith.constant 0 : index
    %c0_0 = arith.constant 0 : index
    %0 = vector.load %arg1[%c0, %c0_0] : memref<16x256xf32, #tpu.memory_space<vmem>>, vector<16x256xf32>
    %c0_1 = arith.constant 0 : index
    %c0_2 = arith.constant 0 : index
    %1 = vector.load %arg2[%c0_1, %c0_2] : memref<256x512xf32, #tpu.memory_space<vmem>>, vector<256x512xf32>
    %cst = arith.constant dense<0.000000e+00> : vector<16x512xf32>
    %2 = tpu.matmul %0, %1, %cst {dimension_numbers = #tpu.dot_dimension_numbers<[1], [0], [0], [1], [0, 0, 1, 1], [], []>} : vector<16x256xf32>, vector<256x512xf32>, vector<16x512xf32> -> vector<16x512xf32>
    %c0_3 = arith.constant 0 : index
    %c0_4 = arith.constant 0 : index
    %3 = vector.load %arg3[%c0_3, %c0_4] : memref<1x512xf32, #tpu.memory_space<vmem>>, vector<1x512xf32>
    %4 = vector.broadcast %3 : vector<1x512xf32> to vector<16x512xf32>
    %5 = arith.addf %2, %4 : vector<16x512xf32>
    %cst_5 = arith.constant 0.000000e+00 : f32
    %6 = vector.broadcast %cst_5 : f32 to vector<16x512xf32>
    %7 = arith.maximumf %5, %6 : vector<16x512xf32>
    %c0_6 = arith.constant 0 : index
    %c0_7 = arith.constant 0 : index
    %8 = vector.load %arg4[%c0_6, %c0_7] : memref<512x128xf32, #tpu.memory_space<vmem>>, vector<512x128xf32>
    %cst_8 = arith.constant dense<0.000000e+00> : vector<16x128xf32>
    %9 = tpu.matmul %7, %8, %cst_8 {dimension_numbers = #tpu.dot_dimension_numbers<[1], [0], [0], [1], [0, 0, 1, 1], [], []>} : vector<16x512xf32>, vector<512x128xf32>, vector<16x128xf32> -> vector<16x128xf32>
    %c0_9 = arith.constant 0 : index
    %c0_10 = arith.constant 0 : index
    %10 = vector.load %arg5[%c0_9, %c0_10] : memref<1x128xf32, #tpu.memory_space<vmem>>, vector<1x128xf32>
    %11 = vector.broadcast %10 : vector<1x128xf32> to vector<16x128xf32>
    %12 = arith.addf %9, %11 : vector<16x128xf32>
    %c0_11 = arith.constant 0 : index
    %c0_12 = arith.constant 0 : index
    %13 = vector.load %arg6[%c0_11, %c0_12] : memref<16x128xf32, #tpu.memory_space<vmem>>, vector<16x128xf32>
    tpu.vector_store %arg6[%c0_11, %c0_12], %12 {strides = array<i32>} : memref<16x128xf32, #tpu.memory_space<vmem>>, vector<16x128xf32>,
    return
  }
  func.func @transform_0(%arg0: i32) -> (i32, i32) {
    %c0_i32 = arith.constant 0 : i32
    %c0_i32_0 = arith.constant 0 : i32
    return %arg0, %c0_i32 : i32, i32
  }
  func.func @transform_1(%arg0: i32) -> (i32, i32) {
    %c0_i32 = arith.constant 0 : i32
    %c0_i32_0 = arith.constant 0 : i32
    %c0_i32_1 = arith.constant 0 : i32
    return %c0_i32, %c0_i32_0 : i32, i32
  }
  func.func @transform_2(%arg0: i32) -> (i32, i32) {
    %c0_i32 = arith.constant 0 : i32
    %c0_i32_0 = arith.constant 0 : i32
    %c0_i32_1 = arith.constant 0 : i32
    return %c0_i32, %c0_i32_0 : i32, i32
  }
  func.func @transform_3(%arg0: i32) -> (i32, i32) {
    %c0_i32 = arith.constant 0 : i32
    %c0_i32_0 = arith.constant 0 : i32
    %c0_i32_1 = arith.constant 0 : i32
    return %c0_i32, %c0_i32_0 : i32, i32
  }
  func.func @transform_4(%arg0: i32) -> (i32, i32) {
    %c0_i32 = arith.constant 0 : i32
    %c0_i32_0 = arith.constant 0 : i32
    %c0_i32_1 = arith.constant 0 : i32
    return %c0_i32, %c0_i32_0 : i32, i32
  }
  func.func @transform_5(%arg0: i32) -> (i32, i32) {
    %c0_i32 = arith.constant 0 : i32
    %c0_i32_0 = arith.constant 0 : i32
    return %arg0, %c0_i32 : i32, i32
  }
}

</mosaic_0001>

<bundles_post_ra>
// kernel: frame_classifier_forward.1
= control target key start
LH: loop header
LB: loop body
LE: loop exit
PB: predicated region body
PF: predicated region fallthrough
CT: control target
= control target key end

     0   :  { %s1462_s1 = inlined_call_operand.vmem [shape: f32[256,512], index: 1, kind: input, shape index: {}]   ;;  %s1463_s0 = inlined_call_operand.vmem [shape: f32[16,256], index: 0, kind: input, shape index: {}]   ;;  %s1464_s3 = inlined_call_operand.vmem [shape: f32[512,128], index: 3, kind: input, shape index: {}]   ;;  %s1465_s2 = inlined_call_operand.vmem [shape: f32[1,512], index: 2, kind: input, shape index: {}]   ;;  %s1466_s4 = inlined_call_operand.vmem [shape: f32[1,128], index: 4, kind: input, shape index: {}]   ;;  %s1467_s5 = inlined_call_operand.vmem [shape: f32[16,128], index: 5, kind: output, shape index: {}]  }
   0x1   :  { %v25_v0 = vld [vmem:[%s1462_s1 + $0x8] sm:$0xff]  ;;  %v27_v2 = vld [vmem:[%s1462_s1 + $0x18] sm:$0xff]  ;;  %v24_v5 = vld [vmem:[%s1462_s1] sm:$0xff] }
   0x2   :  { %v29_v1 = vld [vmem:[%s1462_s1 + $0x28] sm:$0xff]  ;;  %v31_v4 = vld [vmem:[%s1462_s1 + $0x38] sm:$0xff]  ;;  %v28_v6 = vld [vmem:[%s1462_s1 + $0x20] sm:$0xff] }
   0x3   :  { %v640_v3 = vpack.c.bf16 %v29_v1, %v25_v0  ;;  %v704_v7 = vpack.c.bf16 %v31_v4, %v27_v2  ;;  %v642_v8 = vpack.c.bf16 %v28_v6, %v24_v5  ;;  %v26_v9 = vld [vmem:[%s1462_s1 + $0x10] sm:$0xff]  ;;  %v33_v11 = vld [vmem:[%s1462_s1 + $0x48] sm:$0xff]  ;;  %v35_v14 = vld [vmem:[%s1462_s1 + $0x58] sm:$0xff] }
   0x4   :  { %v30_v10 = vld [vmem:[%s1462_s1 + $0x30] sm:$0xff]  ;;  %v37_v13 = vld [vmem:[%s1462_s1 + $0x68] sm:$0xff]  ;;  %v39_v15 = vld [vmem:[%s1462_s1 + $0x78] sm:$0xff] }
   0x5   :  { %641 = vmatprep.subr.bf16.mxu0 %v640_v3  ;;  %v706_v12 = vpack.c.bf16 %v30_v10, %v26_v9  ;;  %705 = vmatprep.subr.bf16.mxu1 %v704_v7  ;;  %v644_v16 = vpack.c.bf16 %v37_v13, %v33_v11  ;;  %v708_v17 = vpack.c.bf16 %v39_v15, %v35_v14  ;;  %v32_v18 = vld [vmem:[%s1462_s1 + $0x40] sm:$0xff]  ;;  %v34_v20 = vld [vmem:[%s1462_s1 + $0x50] sm:$0xff]  ;;  %v41_v23 = vld [vmem:[%s1462_s1 + $0x88] sm:$0xff] }
   0x6   :  { %643 = vmatpush1.bf16.msra.mxu0 %v642_v8  ;;  %v36_v19 = vld [vmem:[%s1462_s1 + $0x60] sm:$0xff]  ;;  %v38_v22 = vld [vmem:[%s1462_s1 + $0x70] sm:$0xff]  ;;  %v45_v24 = vld [vmem:[%s1462_s1 + $0xa8] sm:$0xff] }
   0x7   :  { %707 = vmatpush1.bf16.msra.mxu1 %v706_v12  ;;  %v646_v21 = vpack.c.bf16 %v36_v19, %v32_v18  ;;  %645 = vmatprep.subr.bf16.mxu0 %v644_v16  ;;  %v710_v25 = vpack.c.bf16 %v38_v22, %v34_v20  ;;  %v648_v26 = vpack.c.bf16 %v45_v24, %v41_v23  ;;  %v43_v27 = vld [vmem:[%s1462_s1 + $0x98] sm:$0xff]  ;;  %v40_v29 = vld [vmem:[%s1462_s1 + $0x80] sm:$0xff]  ;;  %v42_v32 = vld [vmem:[%s1462_s1 + $0x90] sm:$0xff] }
   0x8   :  { %709 = vmatprep.subr.bf16.mxu1 %v708_v17  ;;  %v47_v28 = vld [vmem:[%s1462_s1 + $0xb8] sm:$0xff]  ;;  %v44_v31 = vld [vmem:[%s1462_s1 + $0xa0] sm:$0xff]  ;;  %v46_v33 = vld [vmem:[%s1462_s1 + $0xb0] sm:$0xff] }
   0x9   :  { %v712_v30 = vpack.c.bf16 %v47_v28, %v43_v27  ;;  %v650_v34 = vpack.c.bf16 %v44_v31, %v40_v29  ;;  %v49_v35 = vld [vmem:[%s1462_s1 + $0xc8] sm:$0xff]  ;;  %v51_v37 = vld [vmem:[%s1462_s1 + $0xd8] sm:$0xff]  ;;  %v714_v38 = vpack.c.bf16 %v46_v33, %v42_v32  ;;  %v48_v41 = vld [vmem:[%s1462_s1 + $0xc0] sm:$0xff] }
   0xa   :  { %647 = vmatpush1.bf16.msra.mxu0 %v646_v21  ;;  %v53_v36 = vld [vmem:[%s1462_s1 + $0xe8] sm:$0xff]  ;;  %v55_v40 = vld [vmem:[%s1462_s1 + $0xf8] sm:$0xff]  ;;  %v52_v42 = vld [vmem:[%s1462_s1 + $0xe0] sm:$0xff] }
   0xb   :  { %711 = vmatpush1.bf16.msra.mxu1 %v710_v25  ;;  %649 = vmatprep.subr.bf16.mxu0 %v648_v26  ;;  %v652_v39 = vpack.c.bf16 %v53_v36, %v49_v35  ;;  %v716_v43 = vpack.c.bf16 %v55_v40, %v51_v37  ;;  %v50_v44 = vld [vmem:[%s1462_s1 + $0xd0] sm:$0xff]  ;;  %v57_v46 = vld [vmem:[%s1462_s1 + $0x108] sm:$0xff]  ;;  %v59_v48 = vld [vmem:[%s1462_s1 + $0x118] sm:$0xff]  ;;  %v654_v50 = vpack.c.bf16 %v52_v42, %v48_v41 }
   0xc   :  { %713 = vmatprep.subr.bf16.mxu1 %v712_v30  ;;  %v54_v45 = vld [vmem:[%s1462_s1 + $0xf0] sm:$0xff]  ;;  %v61_v47 = vld [vmem:[%s1462_s1 + $0x128] sm:$0xff]  ;;  %v63_v49 = vld [vmem:[%s1462_s1 + $0x138] sm:$0xff] }
   0xd   :  { %v718_v51 = vpack.c.bf16 %v54_v45, %v50_v44  ;;  %v656_v52 = vpack.c.bf16 %v61_v47, %v57_v46  ;;  %v56_v53 = vld [vmem:[%s1462_s1 + $0x100] sm:$0xff]  ;;  %v58_v55 = vld [vmem:[%s1462_s1 + $0x110] sm:$0xff]  ;;  %v720_v56 = vpack.c.bf16 %v63_v49, %v59_v48  ;;  %v65_v58 = vld [vmem:[%s1462_s1 + $0x148] sm:$0xff] }
   0xe   :  { %651 = vmatpush1.bf16.msra.mxu0 %v650_v34  ;;  %v60_v54 = vld [vmem:[%s1462_s1 + $0x120] sm:$0xff]  ;;  %v62_v57 = vld [vmem:[%s1462_s1 + $0x130] sm:$0xff]  ;;  %v69_v59 = vld [vmem:[%s1462_s1 + $0x168] sm:$0xff] }
   0xf   :  { %715 = vmatpush1.bf16.msra.mxu1 %v714_v38  ;;  %653 = vmatprep.subr.bf16.mxu0 %v652_v39  ;;  %v67_v60 = vld [vmem:[%s1462_s1 + $0x158] sm:$0xff]  ;;  %v658_v62 = vpack.c.bf16 %v60_v54, %v56_v53  ;;  %v722_v63 = vpack.c.bf16 %v62_v57, %v58_v55  ;;  %v660_v0 = vpack.c.bf16 %v69_v59, %v65_v58  ;;  %v64_v1 = vld [vmem:[%s1462_s1 + $0x140] sm:$0xff]  ;;  %v66_v3 = vld [vmem:[%s1462_s1 + $0x150] sm:$0xff] }
  0x10   :  { %717 = vmatprep.subr.bf16.mxu1 %v716_v43  ;;  %v71_v61 = vld [vmem:[%s1462_s1 + $0x178] sm:$0xff]  ;;  %v68_v2 = vld [vmem:[%s1462_s1 + $0x160] sm:$0xff]  ;;  %v70_v5 = vld [vmem:[%s1462_s1 + $0x170] sm:$0xff] }
  0x11   :  { %v724_v4 = vpack.c.bf16 %v71_v61, %v67_v60  ;;  %v73_v6 = vld [vmem:[%s1462_s1 + $0x188] sm:$0xff]  ;;  %v75_v8 = vld [vmem:[%s1462_s1 + $0x198] sm:$0xff]  ;;  %v662_v10 = vpack.c.bf16 %v68_v2, %v64_v1  ;;  %v726_v11 = vpack.c.bf16 %v70_v5, %v66_v3  ;;  %v72_v13 = vld [vmem:[%s1462_s1 + $0x180] sm:$0xff] }
  0x12   :  { %655 = vmatpush1.bf16.msra.mxu0 %v654_v50  ;;  %v77_v7 = vld [vmem:[%s1462_s1 + $0x1a8] sm:$0xff]  ;;  %v79_v9 = vld [vmem:[%s1462_s1 + $0x1b8] sm:$0xff]  ;;  %v76_v14 = vld [vmem:[%s1462_s1 + $0x1a0] sm:$0xff] }
  0x13   :  { %719 = vmatpush1.bf16.msra.mxu1 %v718_v51  ;;  %657 = vmatprep.subr.bf16.mxu0 %v656_v52  ;;  %v664_v12 = vpack.c.bf16 %v77_v7, %v73_v6  ;;  %v74_v15 = vld [vmem:[%s1462_s1 + $0x190] sm:$0xff]  ;;  %v728_v16 = vpack.c.bf16 %v79_v9, %v75_v8  ;;  %v81_v18 = vld [vmem:[%s1462_s1 + $0x1c8] sm:$0xff]  ;;  %v83_v20 = vld [vmem:[%s1462_s1 + $0x1d8] sm:$0xff]  ;;  %v666_v22 = vpack.c.bf16 %v76_v14, %v72_v13 }
  0x14   :  { %721 = vmatprep.subr.bf16.mxu1 %v720_v56  ;;  %v78_v17 = vld [vmem:[%s1462_s1 + $0x1b0] sm:$0xff]  ;;  %v85_v19 = vld [vmem:[%s1462_s1 + $0x1e8] sm:$0xff]  ;;  %v87_v21 = vld [vmem:[%s1462_s1 + $0x1f8] sm:$0xff] }
  0x15   :  { %v730_v23 = vpack.c.bf16 %v78_v17, %v74_v15  ;;  %v668_v24 = vpack.c.bf16 %v85_v19, %v81_v18  ;;  %v80_v25 = vld [vmem:[%s1462_s1 + $0x1c0] sm:$0xff]  ;;  %v82_v27 = vld [vmem:[%s1462_s1 + $0x1d0] sm:$0xff]  ;;  %v732_v28 = vpack.c.bf16 %v87_v21, %v83_v20  ;;  %v89_v30 = vld [vmem:[%s1462_s1 + $0x208] sm:$0xff] }
  0x16   :  { %659 = vmatpush1.bf16.msra.mxu0 %v658_v62  ;;  %v84_v26 = vld [vmem:[%s1462_s1 + $0x1e0] sm:$0xff]  ;;  %v86_v29 = vld [vmem:[%s1462_s1 + $0x1f0] sm:$0xff]  ;;  %v93_v31 = vld [vmem:[%s1462_s1 + $0x228] sm:$0xff] }
  0x17   :  { %723 = vmatpush1.bf16.msra.mxu1 %v722_v63  ;;  %661 = vmatprep.subr.bf16.mxu0 %v660_v0  ;;  %v91_v32 = vld [vmem:[%s1462_s1 + $0x218] sm:$0xff]  ;;  %v670_v34 = vpack.c.bf16 %v84_v26, %v80_v25  ;;  %v734_v35 = vpack.c.bf16 %v86_v29, %v82_v27  ;;  %v672_v36 = vpack.c.bf16 %v93_v31, %v89_v30  ;;  %v88_v37 = vld [vmem:[%s1462_s1 + $0x200] sm:$0xff]  ;;  %v90_v39 = vld [vmem:[%s1462_s1 + $0x210] sm:$0xff] }
  0x18   :  { %725 = vmatprep.subr.bf16.mxu1 %v724_v4  ;;  %v95_v33 = vld [vmem:[%s1462_s1 + $0x238] sm:$0xff]  ;;  %v92_v38 = vld [vmem:[%s1462_s1 + $0x220] sm:$0xff]  ;;  %v94_v41 = vld [vmem:[%s1462_s1 + $0x230] sm:$0xff] }
  0x19   :  { %v736_v40 = vpack.c.bf16 %v95_v33, %v91_v32  ;;  %v97_v42 = vld [vmem:[%s1462_s1 + $0x248] sm:$0xff]  ;;  %v99_v44 = vld [vmem:[%s1462_s1 + $0x258] sm:$0xff]  ;;  %v674_v46 = vpack.c.bf16 %v92_v38, %v88_v37  ;;  %v738_v47 = vpack.c.bf16 %v94_v41, %v90_v39  ;;  %v96_v49 = vld [vmem:[%s1462_s1 + $0x240] sm:$0xff] }
  0x1a   :  { %663 = vmatpush1.bf16.msra.mxu0 %v662_v10  ;;  %v101_v43 = vld [vmem:[%s1462_s1 + $0x268] sm:$0xff]  ;;  %v103_v45 = vld [vmem:[%s1462_s1 + $0x278] sm:$0xff]  ;;  %v100_v50 = vld [vmem:[%s1462_s1 + $0x260] sm:$0xff] }
  0x1b   :  { %727 = vmatpush1.bf16.msra.mxu1 %v726_v11  ;;  %665 = vmatprep.subr.bf16.mxu0 %v664_v12  ;;  %v676_v48 = vpack.c.bf16 %v101_v43, %v97_v42  ;;  %v98_v51 = vld [vmem:[%s1462_s1 + $0x250] sm:$0xff]  ;;  %v740_v52 = vpack.c.bf16 %v103_v45, %v99_v44  ;;  %v105_v54 = vld [vmem:[%s1462_s1 + $0x288] sm:$0xff]  ;;  %v107_v56 = vld [vmem:[%s1462_s1 + $0x298] sm:$0xff]  ;;  %v678_v58 = vpack.c.bf16 %v100_v50, %v96_v49 }
  0x1c   :  { %729 = vmatprep.subr.bf16.mxu1 %v728_v16  ;;  %v102_v53 = vld [vmem:[%s1462_s1 + $0x270] sm:$0xff]  ;;  %v109_v55 = vld [vmem:[%s1462_s1 + $0x2a8] sm:$0xff]  ;;  %v111_v57 = vld [vmem:[%s1462_s1 + $0x2b8] sm:$0xff] }
  0x1d   :  { %v742_v59 = vpack.c.bf16 %v102_v53, %v98_v51  ;;  %v680_v60 = vpack.c.bf16 %v109_v55, %v105_v54  ;;  %v104_v61 = vld [vmem:[%s1462_s1 + $0x280] sm:$0xff]  ;;  %v106_v63 = vld [vmem:[%s1462_s1 + $0x290] sm:$0xff]  ;;  %v744_v0 = vpack.c.bf16 %v111_v57, %v107_v56  ;;  %v113_v2 = vld [vmem:[%s1462_s1 + $0x2c8] sm:$0xff] }
  0x1e   :  { %667 = vmatpush1.bf16.msra.mxu0 %v666_v22  ;;  %v108_v62 = vld [vmem:[%s1462_s1 + $0x2a0] sm:$0xff]  ;;  %v110_v1 = vld [vmem:[%s1462_s1 + $0x2b0] sm:$0xff]  ;;  %v117_v3 = vld [vmem:[%s1462_s1 + $0x2e8] sm:$0xff] }
  0x1f   :  { %731 = vmatpush1.bf16.msra.mxu1 %v730_v23  ;;  %669 = vmatprep.subr.bf16.mxu0 %v668_v24  ;;  %v115_v4 = vld [vmem:[%s1462_s1 + $0x2d8] sm:$0xff]  ;;  %v682_v6 = vpack.c.bf16 %v108_v62, %v104_v61  ;;  %v112_v7 = vld [vmem:[%s1462_s1 + $0x2c0] sm:$0xff]  ;;  %v746_v8 = vpack.c.bf16 %v110_v1, %v106_v63  ;;  %v684_v9 = vpack.c.bf16 %v117_v3, %v113_v2  ;;  %v114_v11 = vld [vmem:[%s1462_s1 + $0x2d0] sm:$0xff] }
  0x20   :  { %733 = vmatprep.subr.bf16.mxu1 %v732_v28  ;;  %v119_v5 = vld [vmem:[%s1462_s1 + $0x2f8] sm:$0xff]  ;;  %v116_v10 = vld [vmem:[%s1462_s1 + $0x2e0] sm:$0xff]  ;;  %v118_v12 = vld [vmem:[%s1462_s1 + $0x2f0] sm:$0xff] }
  0x21   :  { %v748_v13 = vpack.c.bf16 %v119_v5, %v115_v4  ;;  %v121_v14 = vld [vmem:[%s1462_s1 + $0x308] sm:$0xff]  ;;  %v123_v17 = vld [vmem:[%s1462_s1 + $0x318] sm:$0xff]  ;;  %v686_v19 = vpack.c.bf16 %v116_v10, %v112_v7  ;;  %v750_v20 = vpack.c.bf16 %v118_v12, %v114_v11  ;;  %v120_v22 = vld [vmem:[%s1462_s1 + $0x300] sm:$0xff] }
  0x22   :  { %671 = vmatpush1.bf16.msra.mxu0 %v670_v34  ;;  %v125_v15 = vld [vmem:[%s1462_s1 + $0x328] sm:$0xff]  ;;  %v127_v18 = vld [vmem:[%s1462_s1 + $0x338] sm:$0xff]  ;;  %v124_v23 = vld [vmem:[%s1462_s1 + $0x320] sm:$0xff] }
  0x23   :  { %735 = vmatpush1.bf16.msra.mxu1 %v734_v35  ;;  %673 = vmatprep.subr.bf16.mxu0 %v672_v36  ;;  %v21_v16 = vld [vmem:[%s1463_s0 + $0x8] sm:$0xff]  ;;  %v688_v21 = vpack.c.bf16 %v125_v15, %v121_v14  ;;  %v122_v24 = vld [vmem:[%s1462_s1 + $0x310] sm:$0xff]  ;;  %v752_v25 = vpack.c.bf16 %v127_v18, %v123_v17  ;;  %v131_v29 = vld [vmem:[%s1462_s1 + $0x358] sm:$0xff]  ;;  %v690_v31 = vpack.c.bf16 %v124_v23, %v120_v22 }
  0x24   :  { %737 = vmatprep.subr.bf16.mxu1 %v736_v40  ;;  %238 = vmatprep.mubr.f32.mxu0 %v21_v16  ;;  %v126_v26 = vld [vmem:[%s1462_s1 + $0x330] sm:$0xff]  ;;  %v129_v27 = vld [vmem:[%s1462_s1 + $0x348] sm:$0xff]  ;;  %v135_v30 = vld [vmem:[%s1462_s1 + $0x378] sm:$0xff] }
  0x25   :  { %315 = vmatprep.mubr.f32.mxu1 %v21_v16  ;;  %v133_v28 = vld [vmem:[%s1462_s1 + $0x368] sm:$0xff]  ;;  %v754_v32 = vpack.c.bf16 %v126_v26, %v122_v24  ;;  %v128_v34 = vld [vmem:[%s1462_s1 + $0x340] sm:$0xff]  ;;  %v130_v36 = vld [vmem:[%s1462_s1 + $0x350] sm:$0xff]  ;;  %v756_v37 = vpack.c.bf16 %v135_v30, %v131_v29 }
  0x26   :  { %675 = vmatpush1.bf16.msra.mxu0 %v674_v46  ;;  %v692_v33 = vpack.c.bf16 %v133_v28, %v129_v27  ;;  %v132_v35 = vld [vmem:[%s1462_s1 + $0x360] sm:$0xff]  ;;  %v134_v38 = vld [vmem:[%s1462_s1 + $0x370] sm:$0xff]  ;;  %v137_v39 = vld [vmem:[%s1462_s1 + $0x388] sm:$0xff] }
  0x27   :  { %739 = vmatpush1.bf16.msra.mxu1 %v738_v47  ;;  %677 = vmatprep.subr.bf16.mxu0 %v676_v48  ;;  %v141_v40 = vld [vmem:[%s1462_s1 + $0x3a8] sm:$0xff]  ;;  %v139_v41 = vld [vmem:[%s1462_s1 + $0x398] sm:$0xff]  ;;  %v694_v43 = vpack.c.bf16 %v132_v35, %v128_v34  ;;  %v758_v44 = vpack.c.bf16 %v134_v38, %v130_v36  ;;  %v136_v46 = vld [vmem:[%s1462_s1 + $0x380] sm:$0xff] }
  0x28   :  { %741 = vmatprep.subr.bf16.mxu1 %v740_v52  ;;  %v143_v42 = vld [vmem:[%s1462_s1 + $0x3b8] sm:$0xff]  ;;  %v696_v45 = vpack.c.bf16 %v141_v40, %v137_v39  ;;  %v140_v47 = vld [vmem:[%s1462_s1 + $0x3a0] sm:$0xff]  ;;  %v138_v48 = vld [vmem:[%s1462_s1 + $0x390] sm:$0xff] }
  0x29   :  { %v760_v49 = vpack.c.bf16 %v143_v42, %v139_v41  ;;  %v142_v50 = vld [vmem:[%s1462_s1 + $0x3b0] sm:$0xff]  ;;  %v145_v51 = vld [vmem:[%s1462_s1 + $0x3c8] sm:$0xff]  ;;  %v147_v53 = vld [vmem:[%s1462_s1 + $0x3d8] sm:$0xff]  ;;  %v698_v55 = vpack.c.bf16 %v140_v47, %v136_v46 }
  0x2a   :  { %679 = vmatpush1.bf16.msra.mxu0 %v678_v58  ;;  %v149_v52 = vld [vmem:[%s1462_s1 + $0x3e8] sm:$0xff]  ;;  %v151_v54 = vld [vmem:[%s1462_s1 + $0x3f8] sm:$0xff]  ;;  %v762_v56 = vpack.c.bf16 %v142_v50, %v138_v48  ;;  %v144_v58 = vld [vmem:[%s1462_s1 + $0x3c0] sm:$0xff] }
  0x2b   :  { %743 = vmatpush1.bf16.msra.mxu1 %v742_v59  ;;  %681 = vmatprep.subr.bf16.mxu0 %v680_v60  ;;  %v700_v57 = vpack.c.bf16 %v149_v52, %v145_v51  ;;  %v148_v59 = vld [vmem:[%s1462_s1 + $0x3e0] sm:$0xff]  ;;  %v146_v60 = vld [vmem:[%s1462_s1 + $0x3d0] sm:$0xff]  ;;  %v764_v61 = vpack.c.bf16 %v151_v54, %v147_v53  ;;  %v385_v2 = vld [vmem:[%s1464_s3 + $0x188] sm:$0xff] }
  0x2c   :  { %745 = vmatprep.subr.bf16.mxu1 %v744_v0  ;;  %v150_v62 = vld [vmem:[%s1462_s1 + $0x3f0] sm:$0xff]  ;;  %v352_v63 = vld [vmem:[%s1464_s3 + $0x80] sm:$0xff]  ;;  %v353_v0 = vld [vmem:[%s1464_s3 + $0x88] sm:$0xff]  ;;  %v702_v3 = vpack.c.bf16 %v148_v59, %v144_v58 }
  0x2d   :  { %v384_v1 = vld [vmem:[%s1464_s3 + $0x180] sm:$0xff]  ;;  %v766_v4 = vpack.c.bf16 %v150_v62, %v146_v60  ;;  %v768_v5 = vpack.c.bf16 %v353_v0, %v352_v63  ;;  %v369_v10 = vld [vmem:[%s1464_s3 + $0x108] sm:$0xff]  ;;  %v354_v11 = vld [vmem:[%s1464_s3 + $0x90] sm:$0xff] }
  0x2e   :  { %683 = vmatpush1.bf16.msra.mxu0 %v682_v6  ;;  %v800_v6 = vpack.c.bf16 %v385_v2, %v384_v1  ;;  %v336_v7 = vld [vmem:[%s1464_s3] sm:$0xff]  ;;  %v355_v12 = vld [vmem:[%s1464_s3 + $0x98] sm:$0xff]  ;;  %v386_v14 = vld [vmem:[%s1464_s3 + $0x190] sm:$0xff] }
  0x2f   :  { %747 = vmatpush1.bf16.msra.mxu1 %v746_v8  ;;  %685 = vmatprep.subr.bf16.mxu0 %v684_v9  ;;  %v337_v8 = vld [vmem:[%s1464_s3 + $0x8] sm:$0xff]  ;;  %v368_v9 = vld [vmem:[%s1464_s3 + $0x100] sm:$0xff]  ;;  %v387_v15 = vld [vmem:[%s1464_s3 + $0x198] sm:$0xff] }
  0x30   :  { %749 = vmatprep.subr.bf16.mxu1 %v748_v13  ;;  %v20_v13 = vld [vmem:[%s1463_s0] sm:$0xff]  ;;  %v23_v16 = vld [vmem:[%s1463_s0 + $0x18] sm:$0xff]  ;;  %v770_v17 = vpack.c.bf16 %v337_v8, %v336_v7  ;;  %v802_v18 = vpack.c.bf16 %v369_v10, %v368_v9  ;;  %v370_v22 = vld [vmem:[%s1464_s3 + $0x110] sm:$0xff]  ;;  %v804_v23 = vpack.c.bf16 %v387_v15, %v386_v14 }
  0x31   :  { %v371_v24 = vld [vmem:[%s1464_s3 + $0x118] sm:$0xff]  ;;  %v357_v26 = vld [vmem:[%s1464_s3 + $0xa8] sm:$0xff]  ;;  %v22_v27 = vld [vmem:[%s1463_s0 + $0x10] sm:$0xff] }
  0x32   :  { %687 = vmatpush1.bf16.msra.mxu0 %v686_v19  ;;  %v772_v19 = vpack.c.bf16 %v355_v12, %v354_v11  ;;  %v388_v28 = vld [vmem:[%s1464_s3 + $0x1a0] sm:$0xff]  ;;  %v389_v29 = vld [vmem:[%s1464_s3 + $0x1a8] sm:$0xff]  ;;  %v358_v38 = vld [vmem:[%s1464_s3 + $0xb0] sm:$0xff] }
  0x33   :  { %751 = vmatpush1.bf16.msra.mxu1 %v750_v20  ;;  %689 = vmatprep.subr.bf16.mxu0 %v688_v21  ;;  %v338_v20 = vld [vmem:[%s1464_s3 + $0x10] sm:$0xff]  ;;  %v339_v21 = vld [vmem:[%s1464_s3 + $0x18] sm:$0xff]  ;;  %v341_v34 = vld [vmem:[%s1464_s3 + $0x28] sm:$0xff]  ;;  %v808_v36 = vpack.c.bf16 %v389_v29, %v388_v28 }
  0x34   :  { %753 = vmatprep.subr.bf16.mxu1 %v752_v25  ;;  %v356_v25 = vld [vmem:[%s1464_s3 + $0xa0] sm:$0xff]  ;;  %v774_v30 = vpack.c.bf16 %v339_v21, %v338_v20  ;;  %v359_v39 = vld [vmem:[%s1464_s3 + $0xb8] sm:$0xff]  ;;  %v390_v40 = vld [vmem:[%s1464_s3 + $0x1b0] sm:$0xff] }
  0x35   :  { %v372_v35 = vld [vmem:[%s1464_s3 + $0x120] sm:$0xff]  ;;  %v391_v41 = vld [vmem:[%s1464_s3 + $0x1b8] sm:$0xff]  ;;  %v374_v47 = vld [vmem:[%s1464_s3 + $0x130] sm:$0xff] }
  0x36   :  { %691 = vmatpush1.bf16.msra.mxu0 %v690_v31  ;;  %v806_v31 = vpack.c.bf16 %v371_v24, %v370_v22  ;;  %v343_v46 = vld [vmem:[%s1464_s3 + $0x38] sm:$0xff]  ;;  %v812_v48 = vpack.c.bf16 %v391_v41, %v390_v40  ;;  %v360_v50 = vld [vmem:[%s1464_s3 + $0xc0] sm:$0xff]  ;;  %v361_v51 = vld [vmem:[%s1464_s3 + $0xc8] sm:$0xff] }
  0x37   :  { %755 = vmatpush1.bf16.msra.mxu1 %v754_v32  ;;  %693 = vmatprep.subr.bf16.mxu0 %v692_v33  ;;  %v776_v32 = vpack.c.bf16 %v357_v26, %v356_v25  ;;  %v340_v33 = vld [vmem:[%s1464_s3 + $0x20] sm:$0xff]  ;;  %v393_v53 = vld [vmem:[%s1464_s3 + $0x1c8] sm:$0xff]  ;;  %v362_v62 = vld [vmem:[%s1464_s3 + $0xd0] sm:$0xff] }
  0x38   :  { %757 = vmatprep.subr.bf16.mxu1 %v756_v37  ;;  %v373_v37 = vld [vmem:[%s1464_s3 + $0x128] sm:$0xff]  ;;  %v778_v42 = vpack.c.bf16 %v341_v34, %v340_v33  ;;  %v392_v52 = vld [vmem:[%s1464_s3 + $0x1c0] sm:$0xff]  ;;  %v363_v63 = vld [vmem:[%s1464_s3 + $0xd8] sm:$0xff] }
  0x39   :  { %v345_v58 = vld [vmem:[%s1464_s3 + $0x48] sm:$0xff]  ;;  %v376_v59 = vld [vmem:[%s1464_s3 + $0x140] sm:$0xff]  ;;  %v816_v60 = vpack.c.bf16 %v393_v53, %v392_v52  ;;  %v394_v0 = vld [vmem:[%s1464_s3 + $0x1d0] sm:$0xff] }
  0x3a   :  { %695 = vmatpush1.bf16.msra.mxu0 %v694_v43  ;;  %v810_v43 = vpack.c.bf16 %v373_v37, %v372_v35  ;;  %v395_v1 = vld [vmem:[%s1464_s3 + $0x1d8] sm:$0xff]  ;;  %v378_v7 = vld [vmem:[%s1464_s3 + $0x150] sm:$0xff]  ;;  %v364_v10 = vld [vmem:[%s1464_s3 + $0xe0] sm:$0xff] }
  0x3b   :  { %759 = vmatpush1.bf16.msra.mxu1 %v758_v44  ;;  %697 = vmatprep.subr.bf16.mxu0 %v696_v45  ;;  %v780_v44 = vpack.c.bf16 %v359_v39, %v358_v38  ;;  %v342_v45 = vld [vmem:[%s1464_s3 + $0x30] sm:$0xff]  ;;  %v820_v8 = vpack.c.bf16 %v395_v1, %v394_v0  ;;  %v379_v9 = vld [vmem:[%s1464_s3 + $0x158] sm:$0xff]  ;;  %v365_v11 = vld [vmem:[%s1464_s3 + $0xe8] sm:$0xff] }
  0x3c   :  { %761 = vmatprep.subr.bf16.mxu1 %v760_v49  ;;  %v375_v49 = vld [vmem:[%s1464_s3 + $0x138] sm:$0xff]  ;;  %v782_v54 = vpack.c.bf16 %v343_v46, %v342_v45  ;;  %v396_v12 = vld [vmem:[%s1464_s3 + $0x1e0] sm:$0xff]  ;;  %v822_v15 = vpack.c.bf16 %v379_v9, %v378_v7  ;;  %v381_v22 = vld [vmem:[%s1464_s3 + $0x168] sm:$0xff] }
  0x3d   :  { %v380_v20 = vld [vmem:[%s1464_s3 + $0x160] sm:$0xff]  ;;  %v366_v24 = vld [vmem:[%s1464_s3 + $0xf0] sm:$0xff]  ;;  %v367_v25 = vld [vmem:[%s1464_s3 + $0xf8] sm:$0xff] }
  0x3e   :  { %699 = vmatpush1.bf16.msra.mxu0 %v698_v55  ;;  %v814_v55 = vpack.c.bf16 %v375_v49, %v374_v47  ;;  %v398_v26 = vld [vmem:[%s1464_s3 + $0x1f0] sm:$0xff]  ;;  %v399_v28 = vld [vmem:[%s1464_s3 + $0x1f8] sm:$0xff]  ;;  %v152_v39 = vld [vmem:[%s1465_s2] sm:$0xf] }
  0x3f   :  { %763 = vmatpush1.bf16.msra.mxu1 %v762_v56  ;;  %701 = vmatprep.subr.bf16.mxu0 %v700_v57  ;;  %v784_v56 = vpack.c.bf16 %v361_v51, %v360_v50  ;;  %v344_v57 = vld [vmem:[%s1464_s3 + $0x40] sm:$0xff]  ;;  %v350_v29 = vld [vmem:[%s1464_s3 + $0x70] sm:$0xff]  ;;  %v383_v34 = vld [vmem:[%s1464_s3 + $0x178] sm:$0xff] }
  0x40   :  { %765 = vmatprep.subr.bf16.mxu1 %v764_v61  ;;  %v377_v61 = vld [vmem:[%s1464_s3 + $0x148] sm:$0xff]  ;;  %v786_v2 = vpack.c.bf16 %v345_v58, %v344_v57  ;;  %v382_v33 = vld [vmem:[%s1464_s3 + $0x170] sm:$0xff]  ;;  %v563_v9 = vld [vmem:[%s1466_s4] ss:$0 sm:$0xff] }
  0x41   :  { %v830_v35 = vpack.c.bf16 %v383_v34, %v382_v33 }
  0x42   :  { %703 = vmatpush1.bf16.msra.mxu0 %v702_v3  ;;  %v818_v3 = vpack.c.bf16 %v377_v61, %v376_v59 }
  0x43   :  { %767 = vmatpush1.bf16.msra.mxu1 %v766_v4  ;;  %769 = vmatprep.subr.bf16.mxu0 %v768_v5  ;;  %v788_v4 = vpack.c.bf16 %v363_v63, %v362_v62  ;;  %v346_v5 = vld [vmem:[%s1464_s3 + $0x50] sm:$0xff] }
  0x44   :  { %801 = vmatprep.subr.bf16.mxu1 %v800_v6  ;;  %v347_v6 = vld [vmem:[%s1464_s3 + $0x58] sm:$0xff] }
  0x45   :  { %239 = vmatmul.mubr.f32.vlgmr.msra.gmra.mrb[0].mxu0 %v20_v13  ;;  %v790_v14 = vpack.c.bf16 %v347_v6, %v346_v5 }
  0x46   :  { %316 = vmatmul.mubr.f32.vlgmr.msra.gmra.mrb[0].mxu1 %v20_v13  ;;  %244 = vmatprep.mubr.f32.mxu0 %v23_v16  ;;  %v397_v13 = vld [vmem:[%s1464_s3 + $0x1e8] sm:$0xff] }
  0x47   :  { %321 = vmatprep.mubr.f32.mxu1 %v23_v16  ;;  %771 = vmatpush3.bf16.msra.mxu0 %v770_v17  ;;  %v792_v16 = vpack.c.bf16 %v365_v11, %v364_v10  ;;  %v824_v17 = vpack.c.bf16 %v397_v13, %v396_v12 }
  0x48   :  { %803 = vmatpush3.bf16.msra.mxu1 %v802_v18  ;;  %773 = vmatprep.subr.bf16.mxu0 %v772_v19  ;;  %v348_v18 = vld [vmem:[%s1464_s3 + $0x60] sm:$0xff]  ;;  %v349_v19 = vld [vmem:[%s1464_s3 + $0x68] sm:$0xff] }
  0x49   :  { %245 = vmatmul.mubr.f32.gmra.mrb[2].mxu0 %v22_v27  ;;  %805 = vmatprep.subr.bf16.mxu1 %v804_v23  ;;  %v794_v21 = vpack.c.bf16 %v349_v19, %v348_v18  ;;  %v826_v23 = vpack.c.bf16 %v381_v22, %v380_v20 }
  0x4a   :  { %322 = vmatmul.mubr.f32.gmra.mrb[2].mxu1 %v22_v27  ;;  %v796_v27 = vpack.c.bf16 %v367_v25, %v366_v24 }
  0x4b   :  { %775 = vmatpush3.bf16.msra.mxu0 %v774_v30  ;;  %v351_v30 = vld [vmem:[%s1464_s3 + $0x78] sm:$0xff] }
  0x4c   :  { %807 = vmatpush3.bf16.msra.mxu1 %v806_v31  ;;  %777 = vmatprep.subr.bf16.mxu0 %v776_v32  ;;  %v828_v31 = vpack.c.bf16 %v399_v28, %v398_v26  ;;  %v798_v32 = vpack.c.bf16 %v351_v30, %v350_v29 }
  0x4d   :  { %809 = vmatprep.subr.bf16.mxu1 %v808_v36  ;;  %v154_v36 = vlaneseq }
  0x4f   :  { %779 = vmatpush3.bf16.msra.mxu0 %v778_v42  ;;  %v155_v37 = vshrl.u32 %v154_v36, 7 }
  0x50   :  { %811 = vmatpush3.bf16.msra.mxu1 %v810_v43  ;;  %781 = vmatprep.subr.bf16.mxu0 %v780_v44 }
  0x51   :  { %813 = vmatprep.subr.bf16.mxu1 %v812_v48  ;;  %v156_v38 = vsub.s32 0, %v155_v37  ;;  %v164_v40 = vsub.s32 2, %v155_v37  ;;  %v160_v41 = vsub.s32 1, %v155_v37  ;;  %v168_v42 = vsub.s32 3, %v155_v37 }
  0x53   :  { %783 = vmatpush3.bf16.msra.mxu0 %v782_v54  ;;  %v157_v43 = vrot.slane %v152_v39, %v156_v38  ;;  %v165_v44 = vrot.slane %v152_v39, %v164_v40  ;;  %v161_v45 = vrot.slane %v152_v39, %v160_v41  ;;  %v169_v46 = vrot.slane %v152_v39, %v168_v42 }
  0x54   :  { %815 = vmatpush3.bf16.msra.mxu1 %v814_v55  ;;  %785 = vmatprep.subr.bf16.mxu0 %v784_v56 }
  0x55   :  { %817 = vmatprep.subr.bf16.mxu1 %v816_v60 }
  0x57   :  { %787 = vmatpush3.bf16.msra.mxu0 %v786_v2 }
  0x58   :  { %819 = vmatpush3.bf16.msra.mxu1 %v818_v3  ;;  %789 = vmatprep.subr.bf16.mxu0 %v788_v4 }
  0x59   :  { %821 = vmatprep.subr.bf16.mxu1 %v820_v8 }
  0x5b   :  { %791 = vmatpush3.bf16.msra.mxu0 %v790_v14 }
  0x5c   :  { %823 = vmatpush3.bf16.msra.mxu1 %v822_v15  ;;  %793 = vmatprep.subr.bf16.mxu0 %v792_v16 }
  0x5d   :  { %825 = vmatprep.subr.bf16.mxu1 %v824_v17 }
  0x5f   :  { %795 = vmatpush3.bf16.msra.mxu0 %v794_v21 }
  0x60   :  { %827 = vmatpush3.bf16.msra.mxu1 %v826_v23  ;;  %797 = vmatprep.subr.bf16.mxu0 %v796_v27 }
  0x61   :  { %829 = vmatprep.subr.bf16.mxu1 %v828_v31 }
  0x63   :  { %799 = vmatpush3.bf16.msra.mxu0 %v798_v32 }
  0x64   :  { %831 = vmatpush3.bf16.msra.mxu1 %v830_v35 }
 0x118   :  { %v240_v47 = vpop.f32.mrb[0].mxu0 }
 0x119   :  { %v241_v48 = vadd.f32 %v240_v47, %v157_v43  ;;  %v317_v49 = vpop.f32.mrb[0].mxu1  ;;  %v242_v50 = vpop.f32.mrb[1].mxu0 }
 0x11a   :  { %v318_v51 = vadd.f32 %v317_v49, %v165_v44  ;;  %v243_v52 = vadd.f32 %v242_v50, %v161_v45  ;;  %v319_v53 = vpop.f32.mrb[1].mxu1 }
 0x11b   :  { %v320_v54 = vadd.f32 %v319_v53, %v169_v46  ;;  %v328_v58 = vmax.f32 %v241_v48, 0.0 }
 0x11c   :  { %v330_v55 = vmax.f32 %v318_v51, 0.0  ;;  %v329_v56 = vmax.f32 %v243_v52, 0.0  ;;  %v246_v57 = vpop.f32.mrb[2].mxu0 }
 0x11d   :  { %v331_v59 = vmax.f32 %v320_v54, 0.0  ;;  %v247_v60 = vadd.f32 %v246_v57, %v157_v43  ;;  %v323_v61 = vpop.f32.mrb[2].mxu1  ;;  %v248_v62 = vpop.f32.mrb[3].mxu0 }
 0x11e   :  { %v324_v63 = vadd.f32 %v323_v61, %v165_v44  ;;  %v249_v0 = vadd.f32 %v248_v62, %v161_v45  ;;  %v325_v1 = vpop.f32.mrb[3].mxu1  ;;  %471 = vmatprep.mubr.f32.mxu0 %v329_v56 }
 0x11f   :  { %v326_v2 = vadd.f32 %v325_v1, %v169_v46  ;;  %546 = vmatprep.mubr.f32.mxu1 %v331_v59  ;;  %472 = vmatmul.mubr.f32.vlgmr.msra.gmra.mrb[4].mxu0 %v328_v58  ;;  %v332_v5 = vmax.f32 %v247_v60, 0.0 }
 0x120   :  { %v334_v3 = vmax.f32 %v324_v63, 0.0  ;;  %v333_v4 = vmax.f32 %v249_v0, 0.0  ;;  %547 = vmatmul.mubr.f32.vlgmr.msra.gmra.mrb[4].mxu1 %v330_v55 }
 0x121   :  { %v335_v6 = vmax.f32 %v326_v2, 0.0 }
 0x122   :  { %476 = vmatprep.mubr.f32.mxu0 %v333_v4 }
 0x123   :  { %551 = vmatprep.mubr.f32.mxu1 %v335_v6  ;;  %477 = vmatmul.mubr.f32.gmra.mrb[6].mxu0 %v332_v5 }
 0x124   :  { %552 = vmatmul.mubr.f32.gmra.mrb[6].mxu1 %v334_v3 }
 0x1f2   :  { %v596_v7 = vpop.f32.mrb[4].mxu0 }
 0x1f3   :  { %v634_v8 = vpop.f32.mrb[4].mxu1  ;;  %v597_v10 = vpop.f32.mrb[5].mxu0 }
 0x1f4   :  { %v598_v11 = vadd.f32 %v597_v10, %v596_v7  ;;  %v635_v12 = vpop.f32.mrb[5].mxu1 }
 0x1f5   :  { %v636_v13 = vadd.f32 %v635_v12, %v634_v8 }
 0x1f6   :  { %v474_v14 = vadd.f32 %v598_v11, %v563_v9  ;;  %v599_v15 = vpop.f32.mrb[6].mxu0 }
 0x1f7   :  { %v637_v16 = vpop.f32.mrb[6].mxu1  ;;  %v600_v17 = vpop.f32.mrb[7].mxu0 }
 0x1f8   :  { %v549_v18 = vadd.f32 %v636_v13, %v474_v14  ;;  %v601_v19 = vadd.f32 %v600_v17, %v599_v15  ;;  %v638_v20 = vpop.f32.mrb[7].mxu1 }
 0x1f9   :  { %v639_v21 = vadd.f32 %v638_v20, %v637_v16 }
 0x1fa   :  { %557 = vst [vmem:[%s1467_s5] sm:$0xff] %v549_v18  ;;  %v479_v22 = vadd.f32 %v601_v19, %v563_v9 }
 0x1fc   :  { %v554_v23 = vadd.f32 %v639_v21, %v479_v22 }
 0x1fe   :  { %558 = vst [vmem:[%s1467_s5 + $0x8] sm:$0xff] %v554_v23 }

</bundles_post_ra>
